<compile_context>
chip_gen: v6e
topology: v6e:2x2x1
jax: 0.10.0
libtpu: 0.0.40
codegen_flags: <defaults>
</compile_context>

<pallas_src>
import math

import jax
import jax.numpy as jnp
from jax.experimental import pallas as pl
from jax.experimental.pallas import tpu as pltpu


_LANE = 128
_ROW_ALIGN = 32              # multiple of 8/16/32 -> tile-aligned chunk starts
_MAX_DMAS_IN_FLIGHT = 4      # small ring of concurrent HBM->HBM DMAs
_MIN_CHUNK_BYTES = 1 << 20   # don't split below ~1 MiB per DMA


def _row_chunks(rows: int, row_bytes: int):
    """Static (start, size) chunks along the row axis of the (rows, 128) slab."""
    total_bytes = rows * row_bytes
    if total_bytes < 2 * _MIN_CHUNK_BYTES or rows < 2 * _ROW_ALIGN:
        return [(0, rows)]
    n = int(min(_MAX_DMAS_IN_FLIGHT, total_bytes // _MIN_CHUNK_BYTES))
    n = max(n, 1)
    chunk = -(-rows // n)                          # cdiv
    chunk = -(-chunk // _ROW_ALIGN) * _ROW_ALIGN   # round up to 32-row multiple
    bounds = []
    start = 0
    while start < rows:
        size = min(chunk, rows - start)
        bounds.append((start, size))
        start += size
    return bounds


def _make_hbm_copy_kernel(bounds, leading_dim):
    """Kernel: issue one HBM->HBM DMA per static chunk, then wait on all."""

    def kernel(x_ref, o_ref, sems):
        copies = []
        for i, (start, size) in enumerate(bounds):
            if start == 0 and size == leading_dim:
                src, dst = x_ref, o_ref           # whole-array copy, no slicing
            else:
                src = x_ref.at[pl.ds(start, size)]
                dst = o_ref.at[pl.ds(start, size)]
            copies.append(pltpu.make_async_copy(src, dst, sems.at[i]))
        for cp in copies:     # all DMAs in flight before the first wait
            cp.start()
        for cp in copies:
            cp.wait()

    return kernel


# TODO(synk): BaseModel.forward is abstract (raises NotImplementedError);
# concrete subclasses (ResNet/UNet/...) would supply the real hot path.
def base_model_forward(x: jax.Array) -> jax.Array:
    """Pass-through 'forward' of BaseModel, executed as chunked HBM->HBM DMAs.

    Returns a fresh array identical to x (same shape/dtype).  If the caller
    donates x and only needs identity semantics it should simply return x and
    skip the copy entirely — this kernel exists for the case where a fresh
    output buffer is genuinely required.
    """
    orig_shape = x.shape
    total = math.prod(orig_shape) if orig_shape else 1
    itemsize = jnp.dtype(x.dtype).itemsize

    if total > 0 and total % _LANE == 0:
        # Lane-multiple total: flatten to a (rows, 128) slab.  Contiguous
        # row-major reshape is a free metadata change (no HBM traffic), and it
        # lets us split the copy into a few byte-sized, tile-aligned chunks so
        # several DMAs are in flight at once.
        rows = total // _LANE
        slab = x.reshape(rows, _LANE)
        bounds = _row_chunks(rows, _LANE * itemsize)
    else:
        # Ragged total: one whole-array DMA of the original shape.  No pad and
        # no post-kernel slice (each would be a full extra HBM pass).
        slab = x if x.ndim >= 1 else x.reshape(1)
        bounds = [(0, slab.shape[0])]

    kernel = _make_hbm_copy_kernel(bounds, slab.shape[0])

    out_slab = pl.pallas_call(
        kernel,
        out_shape=jax.ShapeDtypeStruct(slab.shape, slab.dtype),
        # Both operands stay in HBM; the kernel only enqueues DMA descriptors.
        in_specs=[pl.BlockSpec(memory_space=pl.ANY)],
        out_specs=pl.BlockSpec(memory_space=pl.ANY),
        scratch_shapes=[pltpu.SemaphoreType.DMA((len(bounds),))],
        cost_estimate=pl.CostEstimate(
            flops=0,
            transcendentals=0,
            bytes_accessed=2 * total * itemsize,
        ),
    )(slab)

    return out_slab.reshape(orig_shape)


if __name__ == "__main__":
    key = jax.random.PRNGKey(0)
    # Small NCHW input consistent with a vision-style model interface.
    x = jax.random.normal(key, (2, 4, 16, 16), dtype=jnp.float32)

    y = base_model_forward(x)
    jax.block_until_ready(y)
    assert y.shape == x.shape and y.dtype == x.dtype
    assert bool(jnp.all(y == x))

    # Ragged (non-128-multiple) total exercises the whole-array DMA path.
    x2 = jax.random.normal(jax.random.PRNGKey(0), (3, 5, 7), dtype=jnp.float32)
    y2 = base_model_forward(x2)
    jax.block_until_ready(y2)
    assert y2.shape == x2.shape and y2.dtype == x2.dtype
    assert bool(jnp.all(y2 == x2))

    print("KERNEL_OK")
</pallas_src>

<mosaic_0001>
module attributes {stable_mosaic.version = 11 : i64} {
  func.func @kernel(%arg0: memref<16x128xf32, #tpu.memory_space<any>>, %arg1: memref<16x128xf32, #tpu.memory_space<any>>, %arg2: memref<1x!tpu.dma_semaphore, #tpu.memory_space<semaphore_mem>>) attributes {dimension_semantics = [], scalar_prefetch = 0 : i64, scratch_operands = 1 : i64, tpu.core_type = #tpu.core_type<tc>} {
    %c0_i32 = arith.constant 0 : i32
    %0 = tpu.memref_slice %arg2[%c0_i32] : memref<1x!tpu.dma_semaphore, #tpu.memory_space<semaphore_mem>> -> memref<1x!tpu.dma_semaphore, #tpu.memory_space<semaphore_mem>>
    %1 = tpu.memref_squeeze %0 : memref<1x!tpu.dma_semaphore, #tpu.memory_space<semaphore_mem>> -> memref<!tpu.dma_semaphore, #tpu.memory_space<semaphore_mem>>
    tpu.enqueue_dma source(%arg0 : memref<16x128xf32, #tpu.memory_space<any>>) target(%arg1 : memref<16x128xf32, #tpu.memory_space<any>>) target_semaphore(%1 : memref<!tpu.dma_semaphore, #tpu.memory_space<semaphore_mem>>)
    %c0_i32_0 = arith.constant 0 : i32
    %2 = tpu.memref_slice %arg2[%c0_i32_0] : memref<1x!tpu.dma_semaphore, #tpu.memory_space<semaphore_mem>> -> memref<1x!tpu.dma_semaphore, #tpu.memory_space<semaphore_mem>>
    %3 = tpu.memref_squeeze %2 : memref<1x!tpu.dma_semaphore, #tpu.memory_space<semaphore_mem>> -> memref<!tpu.dma_semaphore, #tpu.memory_space<semaphore_mem>>
    tpu.wait_dma2 semaphore(%3 : memref<!tpu.dma_semaphore, #tpu.memory_space<semaphore_mem>>) src(%arg0 : memref<16x128xf32, #tpu.memory_space<any>>) dst(%arg1 : memref<16x128xf32, #tpu.memory_space<any>>)
    return
  }
}

</mosaic_0001>

<bundles_post_ra>
// kernel: tpu_custom_call.1
= control target key start
LH: loop header
LB: loop body
LE: loop exit
PB: predicated region body
PF: predicated region fallthrough
CT: control target
= control target key end

     0   :  { %s28_s6 = smov [#allocation2]   ;;  %s29_s7 = smov 131072   ;;  %s47_s0 = inlined_call_operand.hbm [shape: f32[16,128], index: 0, kind: input, shape index: {}]   ;;  %s48_s1 = inlined_call_operand.hbm [shape: f32[16,128], index: 1, kind: output, shape index: {}]  }
   0x1   :  { %s30_s8 = smov 0  }
   0x2   :  { %12 = dma.general %s47_s0, 256, %s48_s1, %s28_s6, %s29_s7, [#allocation4], %s30_s8, 0  }
   0x3   :  { %26 = dma.done.wait [#allocation2], 256 }
   0x4   :  { %27 = vsyncadd [#allocation2], 4294967040 }
   0x5   :  { %16 = vsyncmov [#allocation2] }
   0x8   :  { %s17_s13 = vpop.sfrf %16 }
   0x9   :  { %p22_p0 = scmp.ne.s32.totalorder %s17_s13, 0 }
   0xb   :  { %21 = shalt.err (%p22_p0)  }

</bundles_post_ra>
